<compile_context>
chip_gen: v5e
topology: v5e:2x2
jax: 0.10.0
libtpu: 0.0.40
codegen_flags: <defaults>
</compile_context>

<pallas_src>
import jax
import jax.numpy as jnp
from jax.experimental import pallas as pl
from jax.experimental.pallas import tpu as pltpu


LANE = 128


def _round_up(x, m):
    return ((x + m - 1) // m) * m


# --------------------------------------------------------------------------- #
# Kernel
# --------------------------------------------------------------------------- #
def _valuenet_kernel(s_ref,
                     w1_ref, b1_ref,
                     w2_ref, b2_ref,
                     w3_ref, b3_ref,
                     out_ref):
    x = s_ref[...]
    w_dtype = w1_ref.dtype

    # linear1 + ReLU  (MXU, f32 accumulate; bias-add / ReLU in f32)
    h1 = jnp.dot(x.astype(w_dtype), w1_ref[...],
                 preferred_element_type=jnp.float32)
    h1 = jnp.maximum(h1 + b1_ref[...], 0.0)

    # linear2 + ReLU
    h2 = jnp.dot(h1.astype(w_dtype), w2_ref[...],
                 preferred_element_type=jnp.float32)
    h2 = jnp.maximum(h2 + b2_ref[...], 0.0)

    # value head: VPU multiply + cross-lane reduction against the (1, hidden_p)
    # w3 row (avoids a 127/128-wasted MXU matmul); keep math in f32.
    v = jnp.sum(h2 * w3_ref[...].astype(jnp.float32),
                axis=-1, keepdims=True) + b3_ref[...]

    # Only the real value column goes back to HBM.
    out_ref[...] = v.astype(out_ref.dtype)


# --------------------------------------------------------------------------- #
# Parameter handling
# --------------------------------------------------------------------------- #
def init_params(key, state_size, hidden_size):
    """PyTorch-style nn.Linear init: U(-1/sqrt(fan_in), 1/sqrt(fan_in)).

    Weights are stored pre-transposed as [in, out]; biases as [1, out]."""
    def linear(k, fan_in, fan_out):
        kw, kb = jax.random.split(k)
        bound = 1.0 / jnp.sqrt(jnp.float32(fan_in))
        w = jax.random.uniform(kw, (fan_in, fan_out), jnp.float32, -bound, bound)
        b = jax.random.uniform(kb, (1, fan_out), jnp.float32, -bound, bound)
        return w, b

    k1, k2, k3 = jax.random.split(key, 3)
    l1 = linear(k1, state_size, hidden_size)
    l2 = linear(k2, hidden_size, hidden_size)
    l3 = linear(k3, hidden_size, 1)
    return l1, l2, l3


def pad_params(params, weights_dtype=jnp.float32):
    """One-time zero-padding of weights to lane-dense (128-multiple) hidden width.

    Zero rows/columns contribute nothing (exactly zero in bf16 too), so results
    match on the real lanes.  The state feature dim (rows of w1) stays unpadded
    (it equals the full array dim -> legal BlockSpec).  w3 is stored as a
    (1, hidden_p) row for the VPU value head; biases stay f32."""
    (w1, b1), (w2, b2), (w3, b3) = params
    state_size, hidden = w1.shape
    hidden_p = _round_up(hidden, LANE)

    def pad2(a, rows, cols):
        return jnp.pad(a, ((0, rows - a.shape[0]), (0, cols - a.shape[1])))

    w1p = pad2(w1, state_size, hidden_p).astype(weights_dtype)
    b1p = pad2(b1, 1, hidden_p)                             # f32
    w2p = pad2(w2, hidden_p, hidden_p).astype(weights_dtype)
    b2p = pad2(b2, 1, hidden_p)                             # f32
    w3p = pad2(w3.T, 1, hidden_p).astype(weights_dtype)     # (1, hidden_p) row
    b3p = b3.reshape(1, 1)                                  # (1, 1), f32
    return (w1p, b1p), (w2p, b2p), (w3p, b3p)


def _estimate_vmem_bytes(bt, state_size, hidden_p, w_itemsize):
    """VMEM budget from actual buffer sizes (weights single-buffered,
    I/O blocks double-buffered, f32 h1/h2 intermediates) with 2x headroom."""
    weights = (state_size * hidden_p + hidden_p * hidden_p + hidden_p) * w_itemsize
    biases = (2 * hidden_p + 1) * 4
    io = 2 * bt * state_size * 4 + 2 * bt * 1 * 4
    interm = 2 * bt * hidden_p * 4
    total = weights + biases + io + interm
    return int(min(64 * 1024 * 1024, max(16 * 1024 * 1024, 2 * total)))


# --------------------------------------------------------------------------- #
# Forward wrapper
# --------------------------------------------------------------------------- #
def value_forward(state, padded_params, *, batch_tile=512):
    """ValueNet forward.  Returns [B, 1] state values (f32)."""
    (w1, b1), (w2, b2), (w3, b3) = padded_params
    B, state_size = state.shape
    assert w1.shape[0] == state_size, "state feature dim must match linear1 fan_in"
    hidden_p = w1.shape[1]

    # Big batch tiles amortize per-grid-step overhead; clamp for tiny batches.
    bt = max(8, min(batch_tile, _round_up(B, 8)))
    # Give v7x's second TensorCore work: ensure >= 2 grid blocks for mid-size B.
    if pl.cdiv(B, bt) == 1 and B > 16:
        bt = _round_up(pl.cdiv(B, 2), 8)
    grid = (pl.cdiv(B, bt),)   # no wrapper-side batch pad; ragged last block masked

    batch_map = lambda i: (i, 0)
    const_map = lambda i: (0, 0)

    in_specs = [pl.BlockSpec((bt, state_size), batch_map)]
    for arr in (w1, b1, w2, b2, w3, b3):
        # Constant index_map -> fetched once & resident; single-buffered so no
        # 2x VMEM reservation for never-changing blocks.
        in_specs.append(
            pl.BlockSpec(arr.shape, const_map, pipeline_mode=pl.Buffered(1)))

    vmem_limit = _estimate_vmem_bytes(
        bt, state_size, hidden_p, jnp.dtype(w1.dtype).itemsize)

    return pl.pallas_call(
        _valuenet_kernel,
        out_shape=jax.ShapeDtypeStruct((B, 1), jnp.float32),
        grid=grid,
        in_specs=in_specs,
        out_specs=pl.BlockSpec((bt, 1), batch_map),   # width-1 block == full dim
        compiler_params=pltpu.CompilerParams(
            dimension_semantics=("parallel",),        # shard batch across TCs (v7x)
            vmem_limit_bytes=vmem_limit,
        ),
    )(state, w1, b1, w2, b2, w3, b3)


# --------------------------------------------------------------------------- #
# Pure-JAX reference
# --------------------------------------------------------------------------- #
def value_forward_ref(state, params):
    (w1, b1), (w2, b2), (w3, b3) = params
    h1 = jax.nn.relu(state @ w1 + b1)
    h2 = jax.nn.relu(h1 @ w2 + b2)
    return h2 @ w3 + b3


# --------------------------------------------------------------------------- #
# Demo / correctness checks
# --------------------------------------------------------------------------- #
if __name__ == "__main__":
    state_size = 16
    hidden_size = 32

    key = jax.random.PRNGKey(0)
    k_state, k_params, k_state2 = jax.random.split(key, 3)

    params = init_params(k_params, state_size, hidden_size)
    padded = pad_params(params)                       # f32 weights, lane-dense

    # 1) tiny batch, f32 weights -- exact check
    state = jax.random.normal(k_state, (2, state_size), jnp.float32)
    value = jax.block_until_ready(value_forward(state, padded))
    value_ref = value_forward_ref(state, params)
    assert value.shape == (2, 1), value.shape
    assert jnp.allclose(value, value_ref, atol=1e-5, rtol=1e-5), (value, value_ref)

    # 2) ragged final batch block (B % bt != 0) with a multi-block grid
    state_big = jax.random.normal(k_state2, (70, state_size), jnp.float32)
    ref_big = value_forward_ref(state_big, params)
    out_big = jax.block_until_ready(value_forward(state_big, padded, batch_tile=32))
    assert out_big.shape == (70, 1), out_big.shape
    assert jnp.allclose(out_big, ref_big, atol=1e-5, rtol=1e-5)

    #    same batch through the "split single block into 2 for megacore" path
    out_big2 = jax.block_until_ready(value_forward(state_big, padded))
    assert jnp.allclose(out_big2, ref_big, atol=1e-5, rtol=1e-5)

    # 3) bf16-stored weights (native MXU rate); looser numerics, lane-0 exact zeros
    padded_bf16 = pad_params(params, weights_dtype=jnp.bfloat16)
    value_bf16 = jax.block_until_ready(value_forward(state, padded_bf16))
    assert jnp.allclose(value_bf16, value_ref, atol=3e-2, rtol=3e-2)

    print("KERNEL_OK")
</pallas_src>

<mosaic_0001>
module attributes {stable_mosaic.version = 11 : i64} {
  func.func @_valuenet_kernel(%arg0: i32, %arg1: memref<8x16xf32, #tpu.memory_space<vmem>>, %arg2: memref<16x128xf32, #tpu.memory_space<vmem>>, %arg3: memref<1x128xf32, #tpu.memory_space<vmem>>, %arg4: memref<128x128xf32, #tpu.memory_space<vmem>>, %arg5: memref<1x128xf32, #tpu.memory_space<vmem>>, %arg6: memref<1x128xf32, #tpu.memory_space<vmem>>, %arg7: memref<1x1xf32, #tpu.memory_space<vmem>>, %arg8: memref<8x1xf32, #tpu.memory_space<vmem>>) attributes {dimension_semantics = [#tpu.dimension_semantics<parallel>], iteration_bounds = array<i64: 1>, scalar_prefetch = 0 : i64, scratch_operands = 0 : i64, tpu.core_type = #tpu.core_type<tc>, window_params = [{transform_indices = @transform_0, window_bounds = array<i64: 8, 16>}, {pipeline_mode = #tpu.pipeline_mode<synchronous>, transform_indices = @transform_1, window_bounds = array<i64: 16, 128>}, {pipeline_mode = #tpu.pipeline_mode<synchronous>, transform_indices = @transform_2, window_bounds = array<i64: 1, 128>}, {pipeline_mode = #tpu.pipeline_mode<synchronous>, transform_indices = @transform_3, window_bounds = array<i64: 128, 128>}, {pipeline_mode = #tpu.pipeline_mode<synchronous>, transform_indices = @transform_4, window_bounds = array<i64: 1, 128>}, {pipeline_mode = #tpu.pipeline_mode<synchronous>, transform_indices = @transform_5, window_bounds = array<i64: 1, 128>}, {pipeline_mode = #tpu.pipeline_mode<synchronous>, transform_indices = @transform_6, window_bounds = array<i64: 1, 1>}, {transform_indices = @transform_7, window_bounds = array<i64: 8, 1>}]} {
    %c0 = arith.constant 0 : index
    %c0_0 = arith.constant 0 : index
    %0 = vector.load %arg1[%c0, %c0_0] : memref<8x16xf32, #tpu.memory_space<vmem>>, vector<8x16xf32>
    %c0_1 = arith.constant 0 : index
    %c0_2 = arith.constant 0 : index
    %1 = vector.load %arg2[%c0_1, %c0_2] : memref<16x128xf32, #tpu.memory_space<vmem>>, vector<16x128xf32>
    %cst = arith.constant dense<0.000000e+00> : vector<8x128xf32>
    %2 = tpu.matmul %0, %1, %cst {dimension_numbers = #tpu.dot_dimension_numbers<[1], [0], [0], [1], [0, 0, 1, 1], [], []>} : vector<8x16xf32>, vector<16x128xf32>, vector<8x128xf32> -> vector<8x128xf32>
    %c0_3 = arith.constant 0 : index
    %c0_4 = arith.constant 0 : index
    %3 = vector.load %arg3[%c0_3, %c0_4] : memref<1x128xf32, #tpu.memory_space<vmem>>, vector<1x128xf32>
    %4 = vector.broadcast %3 : vector<1x128xf32> to vector<8x128xf32>
    %5 = arith.addf %2, %4 : vector<8x128xf32>
    %cst_5 = arith.constant 0.000000e+00 : f32
    %6 = vector.broadcast %cst_5 : f32 to vector<8x128xf32>
    %7 = arith.maximumf %5, %6 : vector<8x128xf32>
    %c0_6 = arith.constant 0 : index
    %c0_7 = arith.constant 0 : index
    %8 = vector.load %arg4[%c0_6, %c0_7] : memref<128x128xf32, #tpu.memory_space<vmem>>, vector<128x128xf32>
    %cst_8 = arith.constant dense<0.000000e+00> : vector<8x128xf32>
    %9 = tpu.matmul %7, %8, %cst_8 {dimension_numbers = #tpu.dot_dimension_numbers<[1], [0], [0], [1], [0, 0, 1, 1], [], []>} : vector<8x128xf32>, vector<128x128xf32>, vector<8x128xf32> -> vector<8x128xf32>
    %c0_9 = arith.constant 0 : index
    %c0_10 = arith.constant 0 : index
    %10 = vector.load %arg5[%c0_9, %c0_10] : memref<1x128xf32, #tpu.memory_space<vmem>>, vector<1x128xf32>
    %11 = vector.broadcast %10 : vector<1x128xf32> to vector<8x128xf32>
    %12 = arith.addf %9, %11 : vector<8x128xf32>
    %cst_11 = arith.constant 0.000000e+00 : f32
    %13 = vector.broadcast %cst_11 : f32 to vector<8x128xf32>
    %14 = arith.maximumf %12, %13 : vector<8x128xf32>
    %c0_12 = arith.constant 0 : index
    %c0_13 = arith.constant 0 : index
    %15 = vector.load %arg6[%c0_12, %c0_13] : memref<1x128xf32, #tpu.memory_space<vmem>>, vector<1x128xf32>
    %16 = vector.broadcast %15 : vector<1x128xf32> to vector<8x128xf32>
    %17 = arith.mulf %14, %16 : vector<8x128xf32>
    %cst_14 = arith.constant dense<0.000000e+00> : vector<8xf32>
    %18 = vector.multi_reduction <add>, %17, %cst_14 [1] : vector<8x128xf32> to vector<8xf32>
    %19 = vector.shape_cast %18 : vector<8xf32> to vector<8x1xf32>
    %c0_15 = arith.constant 0 : index
    %c0_16 = arith.constant 0 : index
    %20 = vector.load %arg7[%c0_15, %c0_16] : memref<1x1xf32, #tpu.memory_space<vmem>>, vector<1x1xf32>
    %21 = vector.broadcast %20 : vector<1x1xf32> to vector<8x1xf32>
    %22 = arith.addf %19, %21 : vector<8x1xf32>
    %c0_17 = arith.constant 0 : index
    %c0_18 = arith.constant 0 : index
    %23 = vector.load %arg8[%c0_17, %c0_18] : memref<8x1xf32, #tpu.memory_space<vmem>>, vector<8x1xf32>
    tpu.vector_store %arg8[%c0_17, %c0_18], %22 {strides = array<i32>} : memref<8x1xf32, #tpu.memory_space<vmem>>, vector<8x1xf32>,
    return
  }
  func.func @transform_0(%arg0: i32) -> (i32, i32) {
    %c0_i32 = arith.constant 0 : i32
    %c0_i32_0 = arith.constant 0 : i32
    return %arg0, %c0_i32 : i32, i32
  }
  func.func @transform_1(%arg0: i32) -> (i32, i32) {
    %c0_i32 = arith.constant 0 : i32
    %c0_i32_0 = arith.constant 0 : i32
    %c0_i32_1 = arith.constant 0 : i32
    return %c0_i32, %c0_i32_0 : i32, i32
  }
  func.func @transform_2(%arg0: i32) -> (i32, i32) {
    %c0_i32 = arith.constant 0 : i32
    %c0_i32_0 = arith.constant 0 : i32
    %c0_i32_1 = arith.constant 0 : i32
    return %c0_i32, %c0_i32_0 : i32, i32
  }
  func.func @transform_3(%arg0: i32) -> (i32, i32) {
    %c0_i32 = arith.constant 0 : i32
    %c0_i32_0 = arith.constant 0 : i32
    %c0_i32_1 = arith.constant 0 : i32
    return %c0_i32, %c0_i32_0 : i32, i32
  }
  func.func @transform_4(%arg0: i32) -> (i32, i32) {
    %c0_i32 = arith.constant 0 : i32
    %c0_i32_0 = arith.constant 0 : i32
    %c0_i32_1 = arith.constant 0 : i32
    return %c0_i32, %c0_i32_0 : i32, i32
  }
  func.func @transform_5(%arg0: i32) -> (i32, i32) {
    %c0_i32 = arith.constant 0 : i32
    %c0_i32_0 = arith.constant 0 : i32
    %c0_i32_1 = arith.constant 0 : i32
    return %c0_i32, %c0_i32_0 : i32, i32
  }
  func.func @transform_6(%arg0: i32) -> (i32, i32) {
    %c0_i32 = arith.constant 0 : i32
    %c0_i32_0 = arith.constant 0 : i32
    %c0_i32_1 = arith.constant 0 : i32
    return %c0_i32, %c0_i32_0 : i32, i32
  }
  func.func @transform_7(%arg0: i32) -> (i32, i32) {
    %c0_i32 = arith.constant 0 : i32
    %c0_i32_0 = arith.constant 0 : i32
    return %arg0, %c0_i32 : i32, i32
  }
}

</mosaic_0001>

<bundles_post_ra>
// kernel: tpu_custom_call.1
= control target key start
LH: loop header
LB: loop body
LE: loop exit
PB: predicated region body
PF: predicated region fallthrough
CT: control target
= control target key end

     0   :  { %s319_s0 = inlined_call_operand.vmem [shape: f32[2,16], index: 0, kind: input, shape index: {}]   ;;  %s320_s1 = inlined_call_operand.hbm [shape: f32[16,128], index: 1, kind: input, shape index: {}]   ;;  %s321_s2 = inlined_call_operand.vmem [shape: f32[1,128], index: 2, kind: input, shape index: {}]   ;;  %s322_s3 = inlined_call_operand.hbm [shape: f32[128,128], index: 3, kind: input, shape index: {}]   ;;  %s323_s4 = inlined_call_operand.vmem [shape: f32[1,128], index: 4, kind: input, shape index: {}]   ;;  %s324_s5 = inlined_call_operand.vmem [shape: f32[1,128], index: 5, kind: input, shape index: {}]   ;;  %s325_s6 = inlined_call_operand.<no memory space> [shape: f32[1,1], index: 6, kind: input, shape index: {}]   ;;  %s326_s7 = inlined_call_operand.vmem [shape: f32[2,1], index: 7, kind: output, shape index: {}]  }
   0x1   :  { %v12_v0 = vstv %s325_s6 }
   0x2   :  { %13 = vst [vmem:[#allocation2] sm:$0x1] %v12_v0 }
   0x3   :  { %14 = vsyncpa [#allocation4], 0  ;;  %s22_s28 = sshll.u32 %s320_s1, 4  ;;  %s23_s28 = int_to_ptr.hbm [resolvable:$true] %s22_s28 }
   0x4   :  { %15 = vsyncpa [#allocation6], 0  ;;  %s251_s29 = smov [#allocation3]   ;;  %s37_s10 = sshll.u32 %s322_s3, 4  ;;  %s38_s10 = int_to_ptr.hbm [resolvable:$true] %s37_s10 }
   0x5   :  { %s24_s30 = sshll.u32 %s251_s29, 4  ;;  %s252_s11 = smov 128   ;;  %s25_s30 = int_to_ptr.vmem [resolvable:$true] %s24_s30 }
   0x6   :  { %s253_s12 = smov 8   ;;  %s254_s6 = smov [#allocation5]  }
   0x7   :  { %30 = dma.hbm_to_vmem [thread:$0]  %s23_s28, 256, %s25_s30, [#allocation4], %s252_s11, %s252_s11, %s253_s12  }
   0x8   :  { %s39_s13 = sshll.u32 %s254_s6, 4  ;;  %s40_s13 = int_to_ptr.vmem [resolvable:$true] %s39_s13 }
   0x9   :  { %45 = dma.hbm_to_vmem [thread:$0]  %s38_s10, 2048, %s40_s13, [#allocation6], %s252_s11, %s252_s11, %s253_s12  }
   0xa   :  { %247 = dma.done.wait [#allocation4], 256  }
   0xb   :  { %248 = vsyncadd [#allocation4], 4294967040 }
   0xc   :  { %249 = dma.done.wait [#allocation6], 2048  }
   0xd   :  { %250 = vsyncadd [#allocation6], 4294965248  ;;  %v62_v1 = vld [vmem:[#allocation3 + $0x8] sm:$0xff]  ;;  %v61_v2 = vld [vmem:[#allocation3] sm:$0xff]  ;;  %vm67_vm0 = vcmask 130048   ;;  %vm145_vm1 = vcmask 7168  }
   0xe   :  { %85 = vmatpush.msra.mxu0 %v62_v1  ;;  %v60_v3 = vld [vmem:[%s319_s0] sm:$0xff]  ;;  %v107_v4 = vld [vmem:[#allocation5 + $0x78] sm:$0xff]  ;;  %v104_v7 = vld [vmem:[#allocation5 + $0x60] sm:$0xff] }
   0xf   :  { %v106_v5 = vld [vmem:[#allocation5 + $0x70] sm:$0xff]  ;;  %112 = vmatpush.msra.mxu1 %v107_v4  ;;  %v105_v6 = vld [vmem:[#allocation5 + $0x68] sm:$0xff]  ;;  %v103_v8 = vld [vmem:[#allocation5 + $0x58] sm:$0xff] }
  0x10   :  { %86 = vmatpush.msra.mxu0 %v61_v2  ;;  %v102_v9 = vld [vmem:[#allocation5 + $0x50] sm:$0xff]  ;;  %v101_v10 = vld [vmem:[#allocation5 + $0x48] sm:$0xff]  ;;  %v100_v11 = vld [vmem:[#allocation5 + $0x40] sm:$0xff] }
  0x11   :  { %190 = vmatmul.msk.f32.vlgmr.msra.gmra.mxu0 %vm67_vm0, %v60_v3  ;;  %113 = vmatpush.msra.mxu1 %v106_v5  ;;  %v99_v12 = vld [vmem:[#allocation5 + $0x38] sm:$0xff]  ;;  %v98_v13 = vld [vmem:[#allocation5 + $0x30] sm:$0xff]  ;;  %v97_v14 = vld [vmem:[#allocation5 + $0x28] sm:$0xff] }
  0x12   :  { %v96_v15 = vld [vmem:[#allocation5 + $0x20] sm:$0xff]  ;;  %v95_v16 = vld [vmem:[#allocation5 + $0x18] sm:$0xff]  ;;  %v94_v17 = vld [vmem:[#allocation5 + $0x10] sm:$0xff] }
  0x13   :  { %114 = vmatpush.msra.mxu1 %v105_v6  ;;  %v93_v18 = vld [vmem:[#allocation5 + $0x8] sm:$0xff]  ;;  %v92_v19 = vld [vmem:[#allocation5] sm:$0xff] }
  0x14   :  { %v195_v20 = vld [vmem:[%s321_s2] ss:$0 sm:$0xff] }
  0x15   :  { %115 = vmatpush.msra.mxu1 %v104_v7  ;;  %v196_v24 = vld [vmem:[%s323_s4] ss:$0 sm:$0xff] }
  0x16   :  { %v197_v27 = vld [vmem:[%s324_s5] ss:$0 sm:$0xff] }
  0x17   :  { %116 = vmatpush.msra.mxu1 %v103_v8  ;;  %v198_v30 = vld [vmem:[#allocation2] ss:$0 sm:$0xff] }
  0x19   :  { %117 = vmatpush.msra.mxu1 %v102_v9 }
  0x1b   :  { %118 = vmatpush.msra.mxu1 %v101_v10 }
  0x1d   :  { %119 = vmatpush.msra.mxu1 %v100_v11 }
  0x1f   :  { %120 = vmatpush.msra.mxu1 %v99_v12 }
  0x21   :  { %121 = vmatpush.msra.mxu1 %v98_v13 }
  0x23   :  { %122 = vmatpush.msra.mxu1 %v97_v14 }
  0x25   :  { %123 = vmatpush.msra.mxu1 %v96_v15 }
  0x27   :  { %124 = vmatpush.msra.mxu1 %v95_v16 }
  0x29   :  { %125 = vmatpush.msra.mxu1 %v94_v17 }
  0x2b   :  { %126 = vmatpush.msra.mxu1 %v93_v18 }
  0x2d   :  { %127 = vmatpush.msra.mxu1 %v92_v19 }
  0x8e   :  { %v88_v21 = vpop.f32.mrf.mxu0 }
  0x8f   :  { %v89_v22 = vadd.f32 %v195_v20, %v88_v21 }
  0x91   :  { %v91_v23 = vmax.f32 %v89_v22, 0.0 }
  0x93   :  { %128 = vmatmul.f32.vlgmr.msra.gmra.mxu1 %v91_v23 }
 0x110   :  { %v129_v25 = vpop.f32.mrf.mxu1 }
 0x111   :  { %v130_v26 = vadd.f32 %v196_v24, %v129_v25 }
 0x113   :  { %v132_v28 = vmax.f32 %v130_v26, 0.0 }
 0x115   :  { %v137_v29 = vmul.f32 %v197_v27, %v132_v28 }
 0x117   :  { %138 = vadd.xlane.f32.xlu0 %v137_v29 }
 0x18a   :  { %v139_v31 = vpop.xlane.xlu0 %138 }
 0x18b   :  { %v144_v32 = vadd.f32 %v198_v30, %v139_v31 }
 0x18d   :  { %146 = vst.msk [vmem:[#allocation7] sm:$0xff] %vm145_vm1, %v144_v32 }
 0x194   :  { %v165_v33 = vld [vmem:[#allocation7] sm:$0x3] }
 0x195   :  { %166 = vst [vmem:[%s326_s7] sm:$0x3] %v165_v33 }
 0x196   :  { %184 = vsyncpa [#allocation4], 1 }
 0x197   :  { %185 = vsyncpa [#allocation6], 1 }

</bundles_post_ra>
